<compile_context>
chip_gen: v6e
topology: v6e:2x2x1
jax: 0.10.0
libtpu: 0.0.40
codegen_flags: <defaults>
</compile_context>

<pallas_src>
import functools

import jax
import jax.numpy as jnp
from jax.experimental import pallas as pl
from jax.experimental.pallas import tpu as pltpu

_FEATURE_DIM = 512   # CLIP ViT-B/32 feature dim
_LANE = 128          # TPU lane width; class dim is padded to this


def _round_up(x, m):
    return (x + m - 1) // m * m


def _classifier_kernel(img_ref, txt_ref, w_ref, b_ref, out_ref):
    # Fused add (VPU, f32) + bf16 MXU matmul with f32 accumulation + bias add.
    combined = (img_ref[...] + txt_ref[...]).astype(jnp.bfloat16)   # [tb, 512]
    logits = jnp.dot(combined, w_ref[...],
                     preferred_element_type=jnp.float32)            # [tb, 128]
    out_ref[...] = logits + b_ref[...]                              # lane-dense store


def prepare_classifier_params(weight, bias):
    """One-time parameter prep (do this at model-load time, not per call).

    weight: [num_classes, 512] f32 (PyTorch nn.Linear layout)
    bias:   [num_classes]      f32
    returns (w_t_padded [512, 128] bf16, bias_row [1, 128] f32, num_classes)
    """
    C, D = weight.shape
    assert D == _FEATURE_DIM
    c_pad = _round_up(max(C, 1), _LANE)
    w_t = jnp.zeros((D, c_pad), jnp.bfloat16).at[:, :C].set(
        weight.T.astype(jnp.bfloat16))
    b_row = jnp.zeros((1, c_pad), jnp.float32).at[:, :C].set(
        bias.astype(jnp.float32))
    return w_t, b_row, C


@functools.partial(jax.jit, static_argnames=("num_classes",))
def garbage_classifier_forward(image_features, text_features, w_t, b_row,
                               num_classes):
    """image_features, text_features: [B, 512] f32
       w_t:   [512, 128] bf16 (prepared, lane-padded, transposed)
       b_row: [1, 128]   f32  (prepared, lane-padded)
       returns logits [B, num_classes] f32
    """
    B, D = image_features.shape
    c_pad = w_t.shape[1]

    # Batch tiling: small batches run as a single tile; large batches use
    # 512-row tiles on a parallel grid axis (shardable across TensorCores).
    b_pad = _round_up(B, 8)
    tb = b_pad if b_pad <= 512 else 512
    b_pad = _round_up(b_pad, tb)

    if b_pad != B:
        pad = ((0, b_pad - B), (0, 0))
        image_features = jnp.pad(image_features, pad)
        text_features = jnp.pad(text_features, pad)

    out = pl.pallas_call(
        _classifier_kernel,
        out_shape=jax.ShapeDtypeStruct((b_pad, c_pad), jnp.float32),
        grid=(b_pad // tb,),
        in_specs=[
            pl.BlockSpec((tb, D), lambda i: (i, 0)),
            pl.BlockSpec((tb, D), lambda i: (i, 0)),
            pl.BlockSpec((D, c_pad), lambda i: (0, 0)),
            pl.BlockSpec((1, c_pad), lambda i: (0, 0)),
        ],
        out_specs=pl.BlockSpec((tb, c_pad), lambda i: (i, 0)),
        compiler_params=pltpu.CompilerParams(
            dimension_semantics=("parallel",)),
    )(image_features, text_features, w_t, b_row)

    return out[:B, :num_classes]


if __name__ == "__main__":
    key = jax.random.PRNGKey(0)
    k_img, k_txt, k_w, k_b = jax.random.split(key, 4)

    B = 8            # batch
    D = 512          # CLIP ViT-B/32 feature dim
    NUM_CLASSES = 6  # typical garbage-classification class count

    # Synthetic CLIP features (stand-ins for encode_image / encode_text outputs).
    image_features = jax.random.normal(k_img, (B, D), dtype=jnp.float32)
    text_features = jax.random.normal(k_txt, (B, D), dtype=jnp.float32)

    # Classifier params in PyTorch nn.Linear(512, num_classes) layout.
    weight = jax.random.normal(k_w, (NUM_CLASSES, D), dtype=jnp.float32) * 0.02
    bias = jax.random.normal(k_b, (NUM_CLASSES,), dtype=jnp.float32) * 0.02

    # One-time param prep (transpose + lane-pad + bf16 cast).
    w_t, b_row, n_cls = prepare_classifier_params(weight, bias)

    out = garbage_classifier_forward(image_features, text_features, w_t, b_row,
                                     num_classes=n_cls)
    out = jax.block_until_ready(out)

    # Pure-JAX f32 reference (same math as the PyTorch forward tail).
    ref = (image_features + text_features) @ weight.T + bias
    assert out.shape == (B, NUM_CLASSES)
    # bf16 matmul operands -> modest tolerance vs the f32 reference.
    assert jnp.allclose(out, ref, atol=2e-2, rtol=2e-2), "mismatch vs reference"

    print("KERNEL_OK")
</pallas_src>

<mosaic_0001>
module attributes {stable_mosaic.version = 11 : i64} {
  func.func @_classifier_kernel(%arg0: i32, %arg1: memref<8x512xf32, #tpu.memory_space<vmem>>, %arg2: memref<8x512xf32, #tpu.memory_space<vmem>>, %arg3: memref<512x128xbf16, #tpu.memory_space<vmem>>, %arg4: memref<1x128xf32, #tpu.memory_space<vmem>>, %arg5: memref<8x128xf32, #tpu.memory_space<vmem>>) attributes {dimension_semantics = [#tpu.dimension_semantics<parallel>], iteration_bounds = array<i64: 1>, scalar_prefetch = 0 : i64, scratch_operands = 0 : i64, tpu.core_type = #tpu.core_type<tc>, window_params = [{transform_indices = @transform_0, window_bounds = array<i64: 8, 512>}, {transform_indices = @transform_1, window_bounds = array<i64: 8, 512>}, {pipeline_mode = #tpu.pipeline_mode<synchronous>, transform_indices = @transform_2, window_bounds = array<i64: 512, 128>}, {pipeline_mode = #tpu.pipeline_mode<synchronous>, transform_indices = @transform_3, window_bounds = array<i64: 1, 128>}, {transform_indices = @transform_4, window_bounds = array<i64: 8, 128>}]} {
    %c0 = arith.constant 0 : index
    %c0_0 = arith.constant 0 : index
    %0 = vector.load %arg1[%c0, %c0_0] : memref<8x512xf32, #tpu.memory_space<vmem>>, vector<8x512xf32>
    %c0_1 = arith.constant 0 : index
    %c0_2 = arith.constant 0 : index
    %1 = vector.load %arg2[%c0_1, %c0_2] : memref<8x512xf32, #tpu.memory_space<vmem>>, vector<8x512xf32>
    %2 = arith.addf %0, %1 : vector<8x512xf32>
    %3 = arith.truncf %2 : vector<8x512xf32> to vector<8x512xbf16>
    %c0_3 = arith.constant 0 : index
    %c0_4 = arith.constant 0 : index
    %4 = vector.load %arg3[%c0_3, %c0_4] : memref<512x128xbf16, #tpu.memory_space<vmem>>, vector<512x128xbf16>
    %cst = arith.constant dense<0.000000e+00> : vector<8x128xf32>
    %5 = tpu.matmul %3, %4, %cst {dimension_numbers = #tpu.dot_dimension_numbers<[1], [0], [0], [1], [0, 0, 1, 1], [], []>} : vector<8x512xbf16>, vector<512x128xbf16>, vector<8x128xf32> -> vector<8x128xf32>
    %c0_5 = arith.constant 0 : index
    %c0_6 = arith.constant 0 : index
    %6 = vector.load %arg4[%c0_5, %c0_6] : memref<1x128xf32, #tpu.memory_space<vmem>>, vector<1x128xf32>
    %7 = vector.broadcast %6 : vector<1x128xf32> to vector<8x128xf32>
    %8 = arith.addf %5, %7 : vector<8x128xf32>
    %c0_7 = arith.constant 0 : index
    %c0_8 = arith.constant 0 : index
    %9 = vector.load %arg5[%c0_7, %c0_8] : memref<8x128xf32, #tpu.memory_space<vmem>>, vector<8x128xf32>
    tpu.vector_store %arg5[%c0_7, %c0_8], %8 {strides = array<i32>} : memref<8x128xf32, #tpu.memory_space<vmem>>, vector<8x128xf32>,
    return
  }
  func.func @transform_0(%arg0: i32) -> (i32, i32) {
    %c0_i32 = arith.constant 0 : i32
    %c0_i32_0 = arith.constant 0 : i32
    return %arg0, %c0_i32 : i32, i32
  }
  func.func @transform_1(%arg0: i32) -> (i32, i32) {
    %c0_i32 = arith.constant 0 : i32
    %c0_i32_0 = arith.constant 0 : i32
    return %arg0, %c0_i32 : i32, i32
  }
  func.func @transform_2(%arg0: i32) -> (i32, i32) {
    %c0_i32 = arith.constant 0 : i32
    %c0_i32_0 = arith.constant 0 : i32
    %c0_i32_1 = arith.constant 0 : i32
    return %c0_i32, %c0_i32_0 : i32, i32
  }
  func.func @transform_3(%arg0: i32) -> (i32, i32) {
    %c0_i32 = arith.constant 0 : i32
    %c0_i32_0 = arith.constant 0 : i32
    %c0_i32_1 = arith.constant 0 : i32
    return %c0_i32, %c0_i32_0 : i32, i32
  }
  func.func @transform_4(%arg0: i32) -> (i32, i32) {
    %c0_i32 = arith.constant 0 : i32
    %c0_i32_0 = arith.constant 0 : i32
    return %arg0, %c0_i32 : i32, i32
  }
}

</mosaic_0001>

<bundles_post_ra>
// kernel: garbage_classifier_forward.1
= control target key start
LH: loop header
LB: loop body
LE: loop exit
PB: predicated region body
PF: predicated region fallthrough
CT: control target
= control target key end

     0   :  { %9 = vsyncpa [#allocation3], 0  ;;  %s679_s0 = inlined_call_operand.hbm [shape: f32[8,512], index: 0, kind: input, shape index: {}]   ;;  %s680_s1 = inlined_call_operand.hbm [shape: f32[8,512], index: 1, kind: input, shape index: {}]   ;;  %s681_s2 = inlined_call_operand.hbm [shape: bf16[512,128], index: 2, kind: input, shape index: {}]   ;;  %s682_s3 = inlined_call_operand.vmem [shape: f32[1,128], index: 3, kind: input, shape index: {}]   ;;  %s683_s4 = inlined_call_operand.hbm [shape: f32[8,128], index: 4, kind: output, shape index: {}]  }
   0x1   :  { %10 = vsyncpa [#allocation6], 0 }
   0x2   :  { %11 = vsyncpa [#allocation4], 0  ;;  %s633_s15 = smov [#allocation5]   ;;  %s634_s17 = smov [#allocation2]  }
   0x3   :  { %s28_s16 = sshll.u32 %s633_s15, 4  ;;  %s18_s18 = sshll.u32 %s634_s17, 4  ;;  %s29_s16 = int_to_ptr.vmem [resolvable:$true] %s28_s16  ;;  %s19_s18 = int_to_ptr.vmem [resolvable:$true] %s18_s18 }
   0x4   :  { %s555_s19 = scalar_lea.vmem %s29_s16, 512  ;;  %p560_p1 = scmp.lt.s32.totalorder %s29_s16, %s29_s16 }
   0x5   :  { %p556_p0 = scmp.ne.s32.totalorder %s29_s16, %s555_s19  ;;  %p561_p2 = scmp.lt.s32.totalorder %s555_s19, %s555_s19 }
   0x7   :  { %p562_p3 = por %p561_p2, %p560_p1 }
   0x9   :  { %p563_p4 = pnand %p562_p3, %p556_p0 }
   0xb   :  { %566 = shalt.err (!%p563_p4)
}
   0xc   :  { %31 = dma.hbm_to_vmem [thread:$0]  %s680_s1, 512, %s29_s16, [#allocation6]  }
   0xd   :  { %s575_s22 = scalar_lea.vmem %s19_s18, 512  ;;  %p580_p6 = scmp.lt.s32.totalorder %s19_s18, %s19_s18 }
   0xe   :  { %p576_p5 = scmp.ne.s32.totalorder %s19_s18, %s575_s22  ;;  %p581_p7 = scmp.lt.s32.totalorder %s575_s22, %s575_s22 }
  0x10   :  { %p582_p8 = por %p581_p7, %p580_p6 }
  0x12   :  { %p583_p9 = pnand %p582_p8, %p576_p5 }
  0x14   :  { %586 = shalt.err (!%p583_p9)
}
  0x15   :  { %21 = dma.hbm_to_vmem [thread:$0]  %s679_s0, 512, %s19_s18, [#allocation3]  }
  0x16   :  { %s635_s25 = smov [#allocation7]  }
  0x17   :  { %s37_s26 = sshll.u32 %s635_s25, 4  ;;  %s38_s26 = int_to_ptr.vmem [resolvable:$true] %s37_s26 }
  0x18   :  { %s595_s27 = scalar_lea.vmem %s38_s26, 4096  ;;  %p600_p11 = scmp.lt.s32.totalorder %s38_s26, %s38_s26 }
  0x19   :  { %p596_p10 = scmp.ne.s32.totalorder %s38_s26, %s595_s27  ;;  %p601_p12 = scmp.lt.s32.totalorder %s595_s27, %s595_s27 }
  0x1b   :  { %p602_p13 = por %p601_p12, %p600_p11 }
  0x1d   :  { %p603_p0 = pnand %p602_p13, %p596_p10 }
  0x1f   :  { %606 = shalt.err (!%p603_p0)
}
  0x20   :  { %s636_s1 = smov 64   ;;  %s637_s28 = smov 4  }
  0x21   :  { %43 = dma.hbm_to_vmem [thread:$0]  %s681_s2, 4096, %s38_s26, [#allocation6], %s636_s1, %s636_s1, %s637_s28  }
  0x22   :  { %627 = dma.done.wait [#allocation3], 512  }
  0x23   :  { %628 = vsyncadd [#allocation3], 4294966784 }
  0x24   :  { %629 = dma.done.wait [#allocation6], 4608  }
  0x25   :  { %630 = vsyncadd [#allocation6], 4294962688  ;;  %v515_v0 = vld [vmem:[#allocation7 + $0x78] sm:$0xff]   ;;  %v519_v4 = vld [vmem:[#allocation7 + $0x70] sm:$0xff]   ;;  %s638_s5 = smov [#allocation8]  }
  0x26   :  { %v516_v1 = vld [vmem:[#allocation7 + $0xf8] sm:$0xff]   ;;  %465 = vmatprep.subr.bf16.mxu0 %v515_v0  ;;  %v520_v5 = vld [vmem:[#allocation7 + $0xf0] sm:$0xff]   ;;  %v523_v8 = vld [vmem:[#allocation7 + $0x68] sm:$0xff]   ;;  %s422_s6 = sshll.u32 %s638_s5, 4  ;;  %s423_s6 = int_to_ptr.vmem [resolvable:$true] %s422_s6 }
  0x27   :  { %v517_v2 = vld [vmem:[#allocation7 + $0x38] sm:$0xff]   ;;  %487 = vmatprep.subr.bf16.mxu1 %v516_v1  ;;  %v521_v6 = vld [vmem:[#allocation7 + $0x30] sm:$0xff]   ;;  %v524_v9 = vld [vmem:[#allocation7 + $0xe8] sm:$0xff]   ;;  %s607_s7 = scalar_lea.vmem %s423_s6, 128  ;;  %p612_p2 = scmp.lt.s32.totalorder %s423_s6, %s423_s6 }
  0x28   :  { %v518_v3 = vld [vmem:[#allocation7 + $0xb8] sm:$0xff]   ;;  %466 = vmatpush3.bf16.msra.mxu0 %v517_v2  ;;  %v522_v7 = vld [vmem:[#allocation7 + $0xb0] sm:$0xff]   ;;  %v525_v10 = vld [vmem:[#allocation7 + $0x28] sm:$0xff]   ;;  %p608_p1 = scmp.ne.s32.totalorder %s423_s6, %s607_s7  ;;  %p613_p3 = scmp.lt.s32.totalorder %s607_s7, %s607_s7 }
  0x29   :  { %488 = vmatpush3.bf16.msra.mxu1 %v518_v3  ;;  %467 = vmatprep.subr.bf16.mxu0 %v519_v4  ;;  %v526_v11 = vld [vmem:[#allocation7 + $0xa8] sm:$0xff]   ;;  %v527_v12 = vld [vmem:[#allocation7 + $0x60] sm:$0xff]   ;;  %v531_v16 = vld [vmem:[#allocation7 + $0x58] sm:$0xff]  }
  0x2a   :  { %489 = vmatprep.subr.bf16.mxu1 %v520_v5  ;;  %v528_v13 = vld [vmem:[#allocation7 + $0xe0] sm:$0xff]   ;;  %v532_v17 = vld [vmem:[#allocation7 + $0xd8] sm:$0xff]   ;;  %v535_v20 = vld [vmem:[#allocation7 + $0x50] sm:$0xff]   ;;  %p614_p4 = por %p613_p3, %p612_p2 }
  0x2b   :  { %v529_v14 = vld [vmem:[#allocation7 + $0x20] sm:$0xff]   ;;  %v533_v18 = vld [vmem:[#allocation7 + $0x18] sm:$0xff]   ;;  %v536_v21 = vld [vmem:[#allocation7 + $0xd0] sm:$0xff]  }
  0x2c   :  { %468 = vmatpush3.bf16.msra.mxu0 %v521_v6  ;;  %v530_v15 = vld [vmem:[#allocation7 + $0xa0] sm:$0xff]   ;;  %v534_v19 = vld [vmem:[#allocation7 + $0x98] sm:$0xff]   ;;  %v537_v22 = vld [vmem:[#allocation7 + $0x10] sm:$0xff]   ;;  %p615_p5 = pnand %p614_p4, %p608_p1 }
  0x2d   :  { %490 = vmatpush3.bf16.msra.mxu1 %v522_v7  ;;  %469 = vmatprep.subr.bf16.mxu0 %v523_v8  ;;  %v538_v23 = vld [vmem:[#allocation7 + $0x90] sm:$0xff]   ;;  %v539_v24 = vld [vmem:[#allocation7 + $0x48] sm:$0xff]   ;;  %v543_v28 = vld [vmem:[#allocation7 + $0x40] sm:$0xff]  }
  0x2e   :  { %491 = vmatprep.subr.bf16.mxu1 %v524_v9  ;;  %v540_v25 = vld [vmem:[#allocation7 + $0xc8] sm:$0xff]   ;;  %v544_v29 = vld [vmem:[#allocation7 + $0xc0] sm:$0xff]   ;;  %v59_v34 = vld [vmem:[#allocation2 + $0x18] sm:$0xff] }
  0x2f   :  { %v541_v26 = vld [vmem:[#allocation7 + $0x8] sm:$0xff]   ;;  %v545_v30 = vld [vmem:[#allocation7] sm:$0xff]   ;;  %v63_v36 = vld [vmem:[#allocation5 + $0x18] sm:$0xff] }
  0x30   :  { %470 = vmatpush3.bf16.msra.mxu0 %v525_v10  ;;  %v542_v27 = vld [vmem:[#allocation7 + $0x88] sm:$0xff]   ;;  %v546_v31 = vld [vmem:[#allocation7 + $0x80] sm:$0xff]   ;;  %v67_v39 = vadd.f32 %v63_v36, %v59_v34  ;;  %v58_v41 = vld [vmem:[#allocation2 + $0x10] sm:$0xff] }
  0x31   :  { %492 = vmatpush3.bf16.msra.mxu1 %v526_v11  ;;  %471 = vmatprep.subr.bf16.mxu0 %v527_v12  ;;  %v57_v32 = vld [vmem:[#allocation2 + $0x8] sm:$0xff]  ;;  %v56_v37 = vld [vmem:[#allocation2] sm:$0xff]  ;;  %v62_v42 = vld [vmem:[#allocation5 + $0x10] sm:$0xff] }
  0x32   :  { %493 = vmatprep.subr.bf16.mxu1 %v528_v13  ;;  %v61_v33 = vld [vmem:[#allocation5 + $0x8] sm:$0xff]  ;;  %v60_v38 = vld [vmem:[#allocation5] sm:$0xff]  ;;  %v66_v44 = vadd.f32 %v62_v42, %v58_v41  ;;  %v71_v45 = vpack.c.bf16 %v67_v39, %v67_v39 }
  0x33   :  { %v65_v35 = vadd.f32 %v61_v33, %v57_v32  ;;  %v64_v40 = vadd.f32 %v60_v38, %v56_v37  ;;  %v432_v50 = vld [vmem:[%s682_s3] ss:$0 sm:$0xff] }
  0x34   :  { %472 = vmatpush3.bf16.msra.mxu0 %v529_v14  ;;  %v70_v47 = vpack.c.bf16 %v66_v44, %v66_v44  ;;  %407 = vmatprep.mubr.bf16.mxu1 %v71_v45 }
  0x35   :  { %494 = vmatpush3.bf16.msra.mxu1 %v530_v15  ;;  %473 = vmatprep.subr.bf16.mxu0 %v531_v16  ;;  %v69_v43 = vpack.c.bf16 %v65_v35, %v65_v35  ;;  %v68_v46 = vpack.c.bf16 %v64_v40, %v64_v40 }
  0x36   :  { %495 = vmatprep.subr.bf16.mxu1 %v532_v17 }
  0x37   :  { %367 = vmatprep.mubr.bf16.mxu0 %v69_v43 }
  0x38   :  { %474 = vmatpush3.bf16.msra.mxu0 %v533_v18 }
  0x39   :  { %496 = vmatpush3.bf16.msra.mxu1 %v534_v19  ;;  %475 = vmatprep.subr.bf16.mxu0 %v535_v20 }
  0x3a   :  { %497 = vmatprep.subr.bf16.mxu1 %v536_v21 }
  0x3c   :  { %476 = vmatpush3.bf16.msra.mxu0 %v537_v22 }
  0x3d   :  { %498 = vmatpush3.bf16.msra.mxu1 %v538_v23  ;;  %477 = vmatprep.subr.bf16.mxu0 %v539_v24 }
  0x3e   :  { %499 = vmatprep.subr.bf16.mxu1 %v540_v25 }
  0x40   :  { %478 = vmatpush3.bf16.msra.mxu0 %v541_v26 }
  0x41   :  { %500 = vmatpush3.bf16.msra.mxu1 %v542_v27  ;;  %479 = vmatprep.subr.bf16.mxu0 %v543_v28 }
  0x42   :  { %501 = vmatprep.subr.bf16.mxu1 %v544_v29 }
  0x44   :  { %480 = vmatpush3.bf16.msra.mxu0 %v545_v30 }
  0x45   :  { %502 = vmatpush3.bf16.msra.mxu1 %v546_v31 }
  0x47   :  { %368 = vmatmul.mubr.bf16.vlgmr.msra.gmra.mxu0 %v68_v46 }
  0x48   :  { %408 = vmatmul.mubr.bf16.vlgmr.msra.gmra.mxu1 %v70_v47 }
 0x107   :  { %v481_v48 = vpop.f32.mrf.mxu0 }
 0x108   :  { %v503_v49 = vpop.f32.mrf.mxu1 }
 0x109   :  { %v482_v51 = vpop.f32.mrf.mxu0 }
 0x10a   :  { %v483_v52 = vadd.f32 %v482_v51, %v481_v48  ;;  %v504_v53 = vpop.f32.mrf.mxu1 }
 0x10b   :  { %v484_v54 = vpop.f32.mrf.mxu0  ;;  %v505_v56 = vadd.f32 %v504_v53, %v503_v49 }
 0x10c   :  { %v370_v55 = vadd.f32 %v483_v52, %v432_v50  ;;  %v506_v57 = vpop.f32.mrf.mxu1 }
 0x10d   :  { %v485_v58 = vpop.f32.mrf.mxu0 }
 0x10e   :  { %v410_v59 = vadd.f32 %v505_v56, %v370_v55  ;;  %v507_v60 = vpop.f32.mrf.mxu1 }
 0x110   :  { %415 = vst [vmem:[#allocation8] sm:$0xff] %v410_v59 }
 0x111   :  { %618 = shalt.err (!%p615_p5)
}
 0x112   :  { %425 = dma.vmem_to_hbm [thread:$0]  %s423_s6, 128, %s683_s4, [#allocation4]  }
 0x113   :  { %631 = dma.done.wait [#allocation4], 128  }
 0x114   :  { %632 = vsyncadd [#allocation4], 4294967168 }
 0x115   :  { %429 = vsyncpa [#allocation3], 1 }
 0x116   :  { %430 = vsyncpa [#allocation6], 1 }
 0x117   :  { %431 = vsyncpa [#allocation4], 1 }

</bundles_post_ra>
